<compile_context>
chip_gen: v7x
topology: tpu7x:2x2x1
jax: 0.10.0
libtpu: 0.0.40
codegen_flags: <defaults>
</compile_context>

<pallas_src>
import jax
import jax.numpy as jnp
from jax.experimental import pallas as pl
from jax.experimental.pallas import tpu as pltpu

_LANE = 128


def _round_up(x, m):
    return (x + m - 1) // m * m


def _make_dice_kernel(C, TN, apply_softmax):
    n_chunks = TN // _LANE

    def kernel(x_ref, lab_ref, acc_ref):
        t = pl.program_id(1)

        @pl.when(t == 0)
        def _init():
            acc_ref[...] = jnp.zeros_like(acc_ref)

        x = x_ref[0].astype(jnp.float32)          # (C, TN)  channels on sublanes, pixels on lanes
        lab = lab_ref[0]                          # (1, TN)  int32 labels, lane-dense
        valid = (lab >= 0).astype(jnp.float32)    # (1, TN)  padded pixels carry label -1

        if apply_softmax:
            m = jnp.max(x, axis=0, keepdims=True)             # sublane reduce over C
            e = jnp.exp(x - m)
            s = jnp.sum(e, axis=0, keepdims=True)
            p = e * pl.reciprocal(s, approx=True)             # EUP slot, frees VALU bundles
        else:
            p = x
        p = p * valid                                         # zero out padded pixels

        ch = jax.lax.broadcasted_iota(jnp.int32, (C, TN), 0)  # channel index on sublanes
        onehot = (ch == lab).astype(jnp.float32)              # (C, TN) on-the-fly one-hot

        def lane_fold(v):
            # (C, TN) -> (C, 128): unrolled vreg adds only; the single cross-lane reduce
            # happens once in the JAX glue on the tiny (B, 3, C, 128) output.
            r = v[:, 0:_LANE]
            for k in range(1, n_chunks):
                r = r + v[:, k * _LANE:(k + 1) * _LANE]
            return r

        acc_ref[0, 0] += lane_fold(p * onehot)    # tp partial sums
        acc_ref[0, 1] += lane_fold(p)             # prob-mass partial sums (fp = psum - tp)
        acc_ref[0, 2] += lane_fold(onehot)        # label-count partial sums (fn = cnt - tp)

    return kernel


def soft_dice_loss(net_output, target, *, apply_softmax=False, batch_dice=False,
                   do_bg=True, smooth=1.0, tile_pixels=8192):
    """SoftDiceLoss forward.

    net_output: (B, C, *spatial) logits/probs (any float dtype, e.g. bf16 or f32).
    target:     (B, 1, *spatial) or (B, *spatial) integer label map (may be stored as float).
    apply_softmax=True reproduces apply_nonlin=softmax (as used inside BCEDice / DC+CE losses);
    apply_softmax=False reproduces the module default apply_nonlin=None.
    """
    # TODO(synk): loss_mask and an already-one-hot `gt` input are not fused into the kernel
    #             (the module defaults to loss_mask=None and a label-map target).
    B, C = net_output.shape[0], net_output.shape[1]
    N = 1
    for s in net_output.shape[2:]:
        N *= s

    x = net_output.reshape(B, C, N)               # free reshape of contiguous NCHW
    if target.ndim == net_output.ndim:
        target = target[:, 0]
    labels = target.reshape(B, N).astype(jnp.int32)

    # Pixel tile: multiple of the 128-lane width, bounded so double-buffered blocks stay far
    # below every generation's scoped-VMEM default (v5e 16 MiB, v6e 32 MiB, v7x 64 MiB total).
    TN = min(_round_up(int(tile_pixels), _LANE), _round_up(N, _LANE))
    N_pad = _round_up(N, TN)
    if N_pad != N:
        x = jnp.pad(x, ((0, 0), (0, 0), (0, N_pad - N)))
        labels = jnp.pad(labels, ((0, 0), (0, N_pad - N)), constant_values=-1)
    labels = labels.reshape(B, 1, N_pad)
    n_tiles = N_pad // TN

    acc = pl.pallas_call(
        _make_dice_kernel(C, TN, apply_softmax),
        out_shape=jax.ShapeDtypeStruct((B, 3, C, _LANE), jnp.float32),
        grid_spec=pltpu.PrefetchScalarGridSpec(
            num_scalar_prefetch=0,
            grid=(B, n_tiles),                      # reduction (pixel-tile) axis last
            in_specs=[
                pl.BlockSpec((1, C, TN), lambda b, t: (b, 0, t)),
                pl.BlockSpec((1, 1, TN), lambda b, t: (b, 0, t)),
            ],
            out_specs=pl.BlockSpec((1, 3, C, _LANE), lambda b, t: (b, 0, 0, 0)),
        ),
        compiler_params=pltpu.CompilerParams(
            # Per-b output blocks make the batch axis safe to shard across TensorCores (v7x);
            # the pixel-tile axis is an accumulation and must stay 'arbitrary'.
            dimension_semantics=("parallel", "arbitrary"),
        ),
    )(x, labels)

    # Tiny finish in plain JAX: one cross-lane reduce + dice algebra on (B, C)-sized arrays.
    sums = jnp.sum(acc, axis=-1)                  # (B, 3, C)
    tp, psum, cnt = sums[:, 0], sums[:, 1], sums[:, 2]
    fp = psum - tp
    fn = cnt - tp
    if batch_dice:
        tp, fp, fn = tp.sum(0), fp.sum(0), fn.sum(0)

    nominator = 2.0 * tp + smooth
    denominator = 2.0 * tp + fp + fn + smooth
    dc = nominator / (denominator + 1e-8)
    if not do_bg:
        dc = dc[1:] if batch_dice else dc[:, 1:]
    return -jnp.mean(dc)


def _reference_soft_dice(net_output, target, apply_softmax=False, batch_dice=False,
                         do_bg=True, smooth=1.0):
    """Pure-JAX mirror of the PyTorch SoftDiceLoss forward, for a sanity check."""
    C = net_output.shape[1]
    x = net_output.astype(jnp.float32)
    if apply_softmax:
        x = jax.nn.softmax(x, axis=1)
    labels = target[:, 0] if target.ndim == net_output.ndim else target
    onehot = jax.nn.one_hot(labels.astype(jnp.int32), C, axis=1, dtype=jnp.float32)
    axes = tuple(range(2, net_output.ndim))
    tp = jnp.sum(x * onehot, axis=axes)
    fp = jnp.sum(x * (1.0 - onehot), axis=axes)
    fn = jnp.sum((1.0 - x) * onehot, axis=axes)
    if batch_dice:
        tp, fp, fn = tp.sum(0), fp.sum(0), fn.sum(0)
    dc = (2.0 * tp + smooth) / (2.0 * tp + fp + fn + smooth + 1e-8)
    if not do_bg:
        dc = dc[1:] if batch_dice else dc[:, 1:]
    return -jnp.mean(dc)


if __name__ == "__main__":
    key = jax.random.PRNGKey(0)
    k1, k2 = jax.random.split(key)

    B, C, H, W = 2, 4, 16, 16
    net_output = jax.random.normal(k1, (B, C, H, W), dtype=jnp.float32)
    # target is a (B, 1, H, W) label map stored as float, like the torch module expects
    target = jax.random.randint(k2, (B, 1, H, W), 0, C).astype(jnp.float32)

    # Module default configuration: apply_nonlin=None, batch_dice=False, do_bg=True, smooth=1.0
    out = jax.block_until_ready(soft_dice_loss(net_output, target))
    ref = jax.block_until_ready(_reference_soft_dice(net_output, target))
    assert abs(float(out) - float(ref)) < 2e-3, (float(out), float(ref))

    # Softmax-nonlin configuration (how SoftDiceLoss is used inside BCEDice / DC+CE losses)
    out_sm = jax.block_until_ready(soft_dice_loss(net_output, target, apply_softmax=True))
    ref_sm = jax.block_until_ready(_reference_soft_dice(net_output, target, apply_softmax=True))
    assert abs(float(out_sm) - float(ref_sm)) < 2e-3, (float(out_sm), float(ref_sm))

    print("KERNEL_OK")
</pallas_src>

<mosaic_0001>
module attributes {stable_mosaic.version = 11 : i64} {
  func.func @kernel(%arg0: i32, %arg1: i32, %arg2: memref<1x4x256xf32, #tpu.memory_space<vmem>>, %arg3: memref<1x1x256xi32, #tpu.memory_space<vmem>>, %arg4: memref<1x3x4x128xf32, #tpu.memory_space<vmem>>) attributes {dimension_semantics = [#tpu.dimension_semantics<parallel>, #tpu.dimension_semantics<arbitrary>], iteration_bounds = array<i64: 2, 1>, scalar_prefetch = 0 : i64, scratch_operands = 0 : i64, tpu.core_type = #tpu.core_type<tc>, window_params = [{transform_indices = @transform_0, window_bounds = array<i64: 1, 4, 256>}, {transform_indices = @transform_1, window_bounds = array<i64: 1, 1, 256>}, {transform_indices = @transform_2, window_bounds = array<i64: 1, 3, 4, 128>}]} {
    %c0_i32 = arith.constant 0 : i32
    %0 = arith.cmpi eq, %arg1, %c0_i32 : i32
    %1 = arith.extui %0 : i1 to i32
    %c0_i32_0 = arith.constant 0 : i32
    %2 = arith.cmpi ne, %1, %c0_i32_0 : i32
    scf.if %2 {
      %cst = arith.constant 0.000000e+00 : f32
      %46 = vector.broadcast %cst : f32 to vector<1x3x4x128xf32>
      %c0_29 = arith.constant 0 : index
      %c0_30 = arith.constant 0 : index
      %c0_31 = arith.constant 0 : index
      %c0_32 = arith.constant 0 : index
      %47 = vector.load %arg4[%c0_29, %c0_30, %c0_31, %c0_32] : memref<1x3x4x128xf32, #tpu.memory_space<vmem>>, vector<1x3x4x128xf32>
      tpu.vector_store %arg4[%c0_29, %c0_30, %c0_31, %c0_32], %46 {strides = array<i32>} : memref<1x3x4x128xf32, #tpu.memory_space<vmem>>, vector<1x3x4x128xf32>,
    } else {
    }
    %c0 = arith.constant 0 : index
    %c0_1 = arith.constant 0 : index
    %c0_2 = arith.constant 0 : index
    %3 = vector.load %arg2[%c0, %c0_1, %c0_2] : memref<1x4x256xf32, #tpu.memory_space<vmem>>, vector<1x4x256xf32>
    %4 = vector.shape_cast %3 : vector<1x4x256xf32> to vector<4x256xf32>
    %c0_3 = arith.constant 0 : index
    %c0_4 = arith.constant 0 : index
    %c0_5 = arith.constant 0 : index
    %5 = vector.load %arg3[%c0_3, %c0_4, %c0_5] : memref<1x1x256xi32, #tpu.memory_space<vmem>>, vector<1x1x256xi32>
    %6 = vector.shape_cast %5 : vector<1x1x256xi32> to vector<1x256xi32>
    %c0_i32_6 = arith.constant 0 : i32
    %7 = vector.broadcast %c0_i32_6 : i32 to vector<1x256xi32>
    %8 = arith.cmpi sge, %6, %7 : vector<1x256xi32>
    %9 = arith.extui %8 : vector<1x256xi1> to vector<1x256xi32>
    %10 = arith.sitofp %9 : vector<1x256xi32> to vector<1x256xf32>
    %11 = vector.broadcast %10 : vector<1x256xf32> to vector<4x256xf32>
    %12 = arith.mulf %4, %11 : vector<4x256xf32>
    %13 = tpu.iota {dimensions = array<i32: 0>} : vector<4x256xi32>
    %14 = vector.broadcast %6 : vector<1x256xi32> to vector<4x256xi32>
    %15 = arith.cmpi eq, %13, %14 : vector<4x256xi32>
    %16 = arith.extui %15 : vector<4x256xi1> to vector<4x256xi32>
    %17 = arith.sitofp %16 : vector<4x256xi32> to vector<4x256xf32>
    %c0_7 = arith.constant 0 : index
    %c0_8 = arith.constant 0 : index
    %c0_9 = arith.constant 0 : index
    %c0_10 = arith.constant 0 : index
    %18 = vector.load %arg4[%c0_7, %c0_8, %c0_9, %c0_10] : memref<1x3x4x128xf32, #tpu.memory_space<vmem>>, vector<1x1x4x128xf32>
    %19 = vector.shape_cast %18 : vector<1x1x4x128xf32> to vector<4x128xf32>
    %20 = arith.mulf %12, %17 : vector<4x256xf32>
    %21 = vector.extract_strided_slice %20 {offsets = [0, 0], sizes = [4, 128], strides = [1, 1]} : vector<4x256xf32> to vector<4x128xf32>
    %22 = vector.extract_strided_slice %20 {offsets = [0, 128], sizes = [4, 128], strides = [1, 1]} : vector<4x256xf32> to vector<4x128xf32>
    %23 = arith.addf %21, %22 : vector<4x128xf32>
    %24 = arith.addf %19, %23 : vector<4x128xf32>
    %c0_11 = arith.constant 0 : index
    %c0_12 = arith.constant 0 : index
    %c0_13 = arith.constant 0 : index
    %c0_14 = arith.constant 0 : index
    %25 = vector.load %arg4[%c0_11, %c0_12, %c0_13, %c0_14] : memref<1x3x4x128xf32, #tpu.memory_space<vmem>>, vector<1x1x4x128xf32>
    %26 = vector.shape_cast %25 : vector<1x1x4x128xf32> to vector<4x128xf32>
    %27 = vector.shape_cast %24 : vector<4x128xf32> to vector<1x1x4x128xf32>
    tpu.vector_store %arg4[%c0_11, %c0_12, %c0_13, %c0_14], %27 {strides = array<i32>} : memref<1x3x4x128xf32, #tpu.memory_space<vmem>>, vector<1x1x4x128xf32>,
    %c0_15 = arith.constant 0 : index
    %c1 = arith.constant 1 : index
    %c0_16 = arith.constant 0 : index
    %c0_17 = arith.constant 0 : index
    %28 = vector.load %arg4[%c0_15, %c1, %c0_16, %c0_17] : memref<1x3x4x128xf32, #tpu.memory_space<vmem>>, vector<1x1x4x128xf32>
    %29 = vector.shape_cast %28 : vector<1x1x4x128xf32> to vector<4x128xf32>
    %30 = vector.extract_strided_slice %12 {offsets = [0, 0], sizes = [4, 128], strides = [1, 1]} : vector<4x256xf32> to vector<4x128xf32>
    %31 = vector.extract_strided_slice %12 {offsets = [0, 128], sizes = [4, 128], strides = [1, 1]} : vector<4x256xf32> to vector<4x128xf32>
    %32 = arith.addf %30, %31 : vector<4x128xf32>
    %33 = arith.addf %29, %32 : vector<4x128xf32>
    %c0_18 = arith.constant 0 : index
    %c1_19 = arith.constant 1 : index
    %c0_20 = arith.constant 0 : index
    %c0_21 = arith.constant 0 : index
    %34 = vector.load %arg4[%c0_18, %c1_19, %c0_20, %c0_21] : memref<1x3x4x128xf32, #tpu.memory_space<vmem>>, vector<1x1x4x128xf32>
    %35 = vector.shape_cast %34 : vector<1x1x4x128xf32> to vector<4x128xf32>
    %36 = vector.shape_cast %33 : vector<4x128xf32> to vector<1x1x4x128xf32>
    tpu.vector_store %arg4[%c0_18, %c1_19, %c0_20, %c0_21], %36 {strides = array<i32>} : memref<1x3x4x128xf32, #tpu.memory_space<vmem>>, vector<1x1x4x128xf32>,
    %c0_22 = arith.constant 0 : index
    %c2 = arith.constant 2 : index
    %c0_23 = arith.constant 0 : index
    %c0_24 = arith.constant 0 : index
    %37 = vector.load %arg4[%c0_22, %c2, %c0_23, %c0_24] : memref<1x3x4x128xf32, #tpu.memory_space<vmem>>, vector<1x1x4x128xf32>
    %38 = vector.shape_cast %37 : vector<1x1x4x128xf32> to vector<4x128xf32>
    %39 = vector.extract_strided_slice %17 {offsets = [0, 0], sizes = [4, 128], strides = [1, 1]} : vector<4x256xf32> to vector<4x128xf32>
    %40 = vector.extract_strided_slice %17 {offsets = [0, 128], sizes = [4, 128], strides = [1, 1]} : vector<4x256xf32> to vector<4x128xf32>
    %41 = arith.addf %39, %40 : vector<4x128xf32>
    %42 = arith.addf %38, %41 : vector<4x128xf32>
    %c0_25 = arith.constant 0 : index
    %c2_26 = arith.constant 2 : index
    %c0_27 = arith.constant 0 : index
    %c0_28 = arith.constant 0 : index
    %43 = vector.load %arg4[%c0_25, %c2_26, %c0_27, %c0_28] : memref<1x3x4x128xf32, #tpu.memory_space<vmem>>, vector<1x1x4x128xf32>
    %44 = vector.shape_cast %43 : vector<1x1x4x128xf32> to vector<4x128xf32>
    %45 = vector.shape_cast %42 : vector<4x128xf32> to vector<1x1x4x128xf32>
    tpu.vector_store %arg4[%c0_25, %c2_26, %c0_27, %c0_28], %45 {strides = array<i32>} : memref<1x3x4x128xf32, #tpu.memory_space<vmem>>, vector<1x1x4x128xf32>,
    return
  }
  func.func @transform_0(%arg0: i32, %arg1: i32) -> (i32, i32, i32) {
    %c0_i32 = arith.constant 0 : i32
    %c0_i32_0 = arith.constant 0 : i32
    return %arg0, %c0_i32, %arg1 : i32, i32, i32
  }
  func.func @transform_1(%arg0: i32, %arg1: i32) -> (i32, i32, i32) {
    %c0_i32 = arith.constant 0 : i32
    %c0_i32_0 = arith.constant 0 : i32
    return %arg0, %c0_i32, %arg1 : i32, i32, i32
  }
  func.func @transform_2(%arg0: i32, %arg1: i32) -> (i32, i32, i32, i32) {
    %c0_i32 = arith.constant 0 : i32
    %c0_i32_0 = arith.constant 0 : i32
    %c0_i32_1 = arith.constant 0 : i32
    %c0_i32_2 = arith.constant 0 : i32
    return %arg0, %c0_i32, %c0_i32_0, %c0_i32_1 : i32, i32, i32, i32
  }
}

</mosaic_0001>

<bundles_post_ra>
// kernel: tpu_custom_call.1
= control target key start
LH: loop header
LB: loop body
LE: loop exit
PB: predicated region body
PF: predicated region fallthrough
CT: control target
= control target key end

     0   :  { %7 = vsyncpa [#allocation3], 0  ;;  %s905_s0 = inlined_call_operand.hbm [shape: f32[2,4,256], index: 0, kind: input, shape index: {}]   ;;  %s906_s1 = inlined_call_operand.hbm [shape: s32[2,1,256], index: 1, kind: input, shape index: {}]   ;;  %s907_s2 = inlined_call_operand.hbm [shape: f32[2,3,4,128], index: 2, kind: output, shape index: {}]  }
   0x1   :  { %9 = vsyncpa [#allocation3 + $0x1], 0 }
   0x2   :  { %10 = vsyncpa [#allocation6], 0 }
   0x3   :  { %12 = vsyncpa [#allocation6 + $0x1], 0 }
   0x4   :  { %13 = vsyncpa [#allocation4], 0 }
   0x5   :  { %15 = vsyncpa [#allocation4 + $0x1], 0  ;;  %s675_s9 = smov 0   ;;  %s677_s10 = smov 0  }
   0x6   :  { %s679_s11 = smov 0   ;;  %s681_s12 = smov 0  }
   0x7   :  { %s683_s13 = smov 0   ;;  %s685_s14 = smov 0  }
   0x8 LB: > { %s409_s15 = sadd.s32 4294967295, %s652_s14   ;;  %s410_s16 = sadd.s32 4294967294, %s652_s14   ;;  %s652_s14 = sphi %s685_s14, %s21_s14   ;;  %s648_s13 = sphi %s683_s13, %s927_s13   ;;  %s644_s12 = sphi %s681_s12, %s926_s12   ;;  %s640_s11 = sphi %s679_s11, %s925_s11   ;;  %s636_s10 = sphi %s677_s10, %s924_s10   ;;  %s632_s9 = sphi %s675_s9, %s923_s9  }
   0x9   : > { %s33_s17 = sadd.s32 1, %s648_s13  ;;  %s42_s18 = sadd.s32 1, %s640_s11 }
   0xa   : > { %p35_p0 = scmp.ge.s32.totalorder %s33_s17, 2  ;;  %p49_p1 = scmp.ne.s32.totalorder %s640_s11, %s636_s10 }
   0xb   : > { %p50_p2 = scmp.eq.s32.totalorder %s652_s14, 0  ;;  %p55_p3 = scmp.ne.s32.totalorder %s636_s10, %s632_s9 }
   0xc   : > { %s929_s17 = smov (%p35_p0, %s33_s17), 0  ;;  %p56_p5 = scmp.eq.s32.totalorder %s409_s15, 0 }
   0xd   : > { %p716_p4 = por %p50_p2, %p49_p1  ;;  %s37_s20 = ssub.s32 %s648_s13, %s929_s17 }
   0xe   : > { %p107_p6 = scmp.eq.s32.totalorder %s409_s15, 1  ;;  %p40_p7 = scmp.eq.s32.totalorder %s37_s20, 0 }
   0xf   : > { %p722_p8 = por %p56_p5, %p55_p3  ;;  %p113_p10 = scmp.eq.s32.totalorder %s410_s16, 1 }
  0x10   : > { %p726_p9 = por %p107_p6, %p49_p1  ;;  %p453_p13 = scmp.lt.s32.totalorder %s652_s14, 2 }
  0x11   : > { %s911_s21 = scalar_select %p722_p8, 1, 0 }
  0x12   : > { %s912_s22 = scalar_select %p726_p9, 1, 0 }
  0x13   : > { %s731_s23 = scalar_select %p40_p7, %s640_s11, %s42_s18  }
  0x14   : > { %p733_p11 = por %p113_p10, %p55_p3  ;;  %s740_s25 = sand.u32 1, %s640_s11  }
  0x15   : > { %s413_s26 = sshll.u32 %s740_s25, 3  ;;  %s432_s27 = sshll.u32 %s648_s13, 7 }
  0x16   : > { %s913_s24 = scalar_select %p733_p11, 1, 0 }
  0x17   : > { %s747_s30 = scalar_lea.hbm %s905_s0, %s432_s27  ;;  %s137_s3 = scalar_lea.vmem [#allocation2], %s413_s26 }
  0x18   : > { %s147_s4 = sshll.u32 %s137_s3, 4  ;;  %p753_p0 = pnand %p453_p13, %p716_p4  ;;  %s749_s4 = int_to_ptr.vmem [resolvable:$true] %s147_s4 }
  0x19   : > { %s134_s6 = scalar_lea.sflag [#allocation3], %s740_s25  ;;  %s506_s7 = scalar_lea.hbm %s747_s30, 128 }
  0x1a   : > { %p507_p3 = scmp.ne.s32.totalorder %s747_s30, %s506_s7  ;;  %p508_p5 = pneg %p753_p0 }
  0x1b   : > { %s511_s16 = scalar_lea.hbm %s905_s0, 256  ;;  %p512_p4 = scmp.lt.u32.totalorder %s747_s30, %s905_s0 }
  0x1c   : > { %p509_p6 = pnand %p508_p5, %p507_p3  ;;  %p513_p10 = scmp.lt.u32.totalorder %s511_s16, %s506_s7 }
  0x1d   : > { %p515_p12 = scmp.lt.u32.totalorder %s506_s7, %s747_s30 }
  0x1e   : > { %p510_p7 = pneg %p509_p6  ;;  %p514_p13 = por %p513_p10, %p512_p4 }
  0x20   : > { %p516_p1 = por %p515_p12, %p514_p13 }
  0x22   : > { %p517_p2 = pnand %p516_p1, %p510_p7 }
  0x24   : > { %520 = shalt.err (!%p517_p2)
}
  0x25   : > { %s521_s20 = scalar_lea.vmem %s749_s4, 128  ;;  %s654_s26 = smov [#allocation2]  }
  0x26   : > { %p522_p3 = scmp.ne.s32.totalorder %s749_s4, %s521_s20  ;;  %s526_s27 = sshll.u32 %s654_s26, 4  ;;  %s527_s27 = int_to_ptr.vmem [resolvable:$false] %s526_s27 }
  0x27   : > { %s528_s28 = scalar_lea.vmem %s527_s27, 256  ;;  %p529_p9 = scmp.lt.s32.totalorder %s749_s4, %s527_s27 }
  0x28   : > { %p524_p6 = pnand %p522_p3, %p508_p5  ;;  %p530_p4 = scmp.lt.s32.totalorder %s528_s28, %s521_s20 }
  0x2a   : > { %p525_p11 = pneg %p524_p6  ;;  %p531_p10 = por %p530_p4, %p529_p9 }
  0x2c   : > { %p532_p12 = pnand %p531_p10, %p525_p11 }
  0x2e   : > { %535 = shalt.err (!%p532_p12)
}
  0x2f   : > { %445 = dma.hbm_to_vmem [thread:$0]  (!%p753_p0), %s747_s30, 128, %s749_s4, %s134_s6  }
  0x30   : > { %p915_p1 = scmp.lt.s32.totalorder %s652_s14, 3  ;;  %p916_p2 = scmp.ge.s32.totalorder %s652_s14, 1 }
  0x31   : > { %s416_s3 = sshll.u32 %s740_s25, 1  ;;  %s433_s7 = sshll.u32 %s648_s13, 5 }
  0x32   : > { %p789_p7 = pnand %p916_p2, %p915_p1  ;;  %s798_s16 = scalar_lea.hbm %s906_s1, %s433_s7 }
  0x33   : > { %s158_s18 = scalar_lea.vmem [#allocation5], %s416_s3  ;;  %s155_s30 = scalar_lea.sflag [#allocation6], %s740_s25 }
  0x34   : > { %s917_s29 = scalar_select %p789_p7, 1, 0 }
  0x35   : > { %s168_s19 = sshll.u32 %s158_s18, 4  ;;  %s536_s4 = scalar_lea.hbm %s798_s16, 32  ;;  %s169_s19 = int_to_ptr.vmem [resolvable:$true] %s168_s19 }
  0x36   : > { %p537_p9 = scmp.ne.s32.totalorder %s798_s16, %s536_s4  ;;  %s541_s26 = scalar_lea.hbm %s906_s1, 64 }
  0x37   : > { %p542_p3 = scmp.lt.u32.totalorder %s798_s16, %s906_s1  ;;  %p543_p6 = scmp.lt.u32.totalorder %s541_s26, %s536_s4 }
  0x38   : > { %p539_p11 = pnand %p537_p9, %p508_p5  ;;  %p545_p10 = scmp.lt.u32.totalorder %s536_s4, %s798_s16 }
  0x39   : > { %p544_p4 = por %p543_p6, %p542_p3 }
  0x3a   : > { %p540_p13 = pneg %p539_p11 }
  0x3b   : > { %p546_p12 = por %p545_p10, %p544_p4 }
  0x3d   : > { %p547_p1 = pnand %p546_p12, %p540_p13 }
  0x3f   : > { %550 = shalt.err (!%p547_p1)
}
  0x40   : > { %s551_s25 = scalar_lea.vmem %s169_s19, 32  ;;  %s655_s3 = smov [#allocation5]  }
  0x41   : > { %p552_p2 = scmp.ne.s32.totalorder %s169_s19, %s551_s25  ;;  %s556_s7 = sshll.u32 %s655_s3, 4  ;;  %s557_s7 = int_to_ptr.vmem [resolvable:$false] %s556_s7 }
  0x42   : > { %s558_s8 = scalar_lea.vmem %s557_s7, 64  ;;  %p559_p8 = scmp.lt.s32.totalorder %s169_s19, %s557_s7 }
  0x43   : > { %p554_p9 = pnand %p552_p2, %p508_p5  ;;  %p560_p7 = scmp.lt.s32.totalorder %s558_s8, %s551_s25 }
  0x45   : > { %p555_p11 = pneg %p554_p9  ;;  %p561_p3 = por %p560_p7, %p559_p8 }
  0x47   : > { %p562_p6 = pnand %p561_p3, %p555_p11 }
  0x49   : > { %565 = shalt.err (!%p562_p6)
}
  0x4a   : > { %448 = dma.hbm_to_vmem [thread:$0]  (!%p753_p0), %s798_s16, 32, %s169_s19, %s155_s30  }
  0x4b   : > { %p918_p13 = scmp.ne.s32.totalorder %s917_s29, 0 }
  0x4c   : > { %s823_s15 = sand.u32 (!%p918_p13), 1, %s636_s10   ;;  %p919_p5 = scmp.ne.s32.totalorder (!%p918_p13), %s911_s21, 0 }
  0x4d   : > { %177 = sbr.rel (%p918_p13) target bundleno = 123 (0x7b), region = 28  ;;  %s420_s18 = sshll.u32 (!%p918_p13), %s823_s15, 3 }
  0x4e   : > { %s180_s4 = scalar_lea.sflag (!%p918_p13), [#allocation3], %s823_s15  ;;  %s183_s6 = scalar_lea.vmem (!%p918_p13), [#allocation2], %s420_s18 }
  0x54   : > { %619 = dma.done.wait (%p919_p5), %s180_s4, 128  }
  0x55   : > { %621 = vsyncadd (%p919_p5), %s180_s4, 4294967168  ;;  %s421_s5 = sshll.u32 %s823_s15, 1  ;;  %s189_s29 = scalar_lea.sflag [#allocation6], %s823_s15 }
  0x56   : > { %s192_s16 = scalar_lea.vmem [#allocation5], %s421_s5 }
  0x57   : > { %623 = dma.done.wait (%p919_p5), %s189_s29, 32  }
  0x58   : > { %625 = vsyncadd (%p919_p5), %s189_s29, 4294967264  ;;  %s434_s19 = smul.u32 12, %s823_s15  ;;  %v233_v0 = vlaneseq  ;;  %v656_v2 = vmov 0.0   ;;  %v228_v5 = vld [vmem:[%s192_s16] sm:$0x3]  ;;  %v227_v11 = vld [vmem:[%s183_s6] sm:$0xff] }
  0x59   : > { %vm229_vm0 = vcmp.ge.s32.totalorder %v228_v5, 0  ;;  %s435_s21 = smul.u32 192, %s644_s12  ;;  %s286_s25 = scalar_lea.sflag [#allocation4], %s823_s15 }
  0x5a   : > { %v234_v1 = vshrl.u32 %v233_v0, 7  ;;  %s838_s30 = scalar_lea.vmem [#allocation7], %s434_s19  ;;  %v422_v8 = vsel %vm229_vm0, 1.0, %v656_v2  ;;  %p920_p0 = scmp.ne.s32.totalorder %s912_s22, 0 }
  0x5b   : > { %224 = vst [vmem:[%s838_s30] sm:$0xf] %v656_v2  ;;  %225 = vst [vmem:[%s838_s30 + $0x4] sm:$0xf] %v656_v2  ;;  %s299_s20 = sshll.u32 %s838_s30, 4  ;;  %s853_s28 = scalar_lea.hbm %s907_s2, %s435_s21  ;;  %s855_s20 = int_to_ptr.vmem [resolvable:$true] %s299_s20 }
  0x5c   : > { %226 = vst [vmem:[%s838_s30 + $0x8] sm:$0xf] %v656_v2  ;;  %v235_v3 = vsub.s32 0, %v234_v1  ;;  %v239_v4 = vsub.s32 1, %v234_v1  ;;  %s566_s3 = scalar_lea.vmem %s855_s20, 192  ;;  %s657_s12 = smov [#allocation7]  }
  0x5d   : > { %p567_p8 = scmp.ne.s32.totalorder %s855_s20, %s566_s3  ;;  %s570_s7 = sshll.u32 %s657_s12, 4  ;;  %s571_s7 = int_to_ptr.vmem [resolvable:$false] %s570_s7 }
  0x5e   : > { %v249_v6 = vrot.slane %v228_v5, %v235_v3  ;;  %v253_v7 = vrot.slane %v228_v5, %v239_v4  ;;  %v236_v9 = vrot.slane %v422_v8, %v235_v3  ;;  %v240_v10 = vrot.slane %v422_v8, %v239_v4  ;;  %s572_s8 = scalar_lea.vmem %s571_s7, 384  ;;  %p573_p10 = scmp.lt.s32.totalorder %s855_s20, %s571_s7 }
  0x5f   : > { %p568_p7 = pnand %p567_p8, %p920_p0  ;;  %p574_p12 = scmp.lt.s32.totalorder %s572_s8, %s566_s3 }
  0x60   : > { %vm254_vm1 = vcmp.eq.s32.totalorder %v234_v1, %v249_v6  ;;  %vm255_vm2 = vcmp.eq.s32.totalorder %v234_v1, %v253_v7  ;;  %v241_v15 = vcombine.low %v236_v9, %v240_v10 }
  0x61   : > { %v423_v12 = vsel %vm254_vm1, 1.0, %v656_v2  ;;  %v424_v13 = vsel %vm255_vm2, 1.0, %v656_v2  ;;  %p569_p4 = pneg %p568_p7  ;;  %p575_p1 = por %p574_p12, %p573_p10 }
  0x62   : > { %v263_v16 = vcombine.low %v423_v12, %v424_v13  ;;  %v282_v17 = vadd.f32 %v424_v13, %v423_v12  ;;  %v243_v18 = vmul.f32 %v241_v15, %v227_v11  ;;  %v425_v22 = vld [vmem:[%s838_s30 + $0x4] sm:$0xf]  ;;  %v260_v25 = vld [vmem:[%s838_s30] sm:$0xf] }
  0x63   : > { %v427_v14 = vld [vmem:[%s838_s30 + $0x8] sm:$0xf]  ;;  %p576_p2 = pnand %p575_p1, %p569_p4 }
  0x64   : > { %v283_v19 = vadd.f32 %v427_v14, %v282_v17  ;;  %v265_v20 = vmul.f32 %v263_v16, %v243_v18  ;;  %v275_v21 = vrot.slane %v243_v18, 4 }
  0x66   : > { %428 = vst [vmem:[%s838_s30 + $0x8] sm:$0xf] %v283_v19  ;;  %v267_v23 = vrot.slane %v265_v20, 4  ;;  %v277_v24 = vadd.f32 %v275_v21, %v243_v18 }
  0x68   : > { %v269_v26 = vadd.f32 %v267_v23, %v265_v20  ;;  %v278_v27 = vadd.f32 %v425_v22, %v277_v24 }
  0x6a   : > { %v270_v28 = vadd.f32 %v269_v26, %v260_v25  ;;  %426 = vst [vmem:[%s838_s30 + $0x4] sm:$0xf] %v278_v27 }
  0x6c   : > { %271 = vst [vmem:[%s838_s30] sm:$0xf] %v270_v28 }
  0x6d   : > { %579 = shalt.err (!%p576_p2)
}
  0x6e   : > { %s580_s18 = scalar_lea.hbm %s853_s28, 192  ;;  %s584_s5 = scalar_lea.hbm %s907_s2, 384 }
  0x6f   : > { %p581_p9 = scmp.ne.s32.totalorder %s853_s28, %s580_s18  ;;  %p585_p6 = scmp.lt.u32.totalorder %s853_s28, %s907_s2 }
  0x70   : > { %p586_p13 = scmp.lt.u32.totalorder %s584_s5, %s580_s18  ;;  %p588_p8 = scmp.lt.u32.totalorder %s580_s18, %s853_s28 }
  0x71   : > { %p582_p11 = pnand %p581_p9, %p920_p0 }
  0x72   : > { %p587_p5 = por %p586_p13, %p585_p6 }
  0x73   : > { %p583_p3 = pneg %p582_p11 }
  0x74   : > { %p589_p7 = por %p588_p8, %p587_p5 }
  0x76   : > { %p590_p4 = pnand %p589_p7, %p583_p3 }
  0x78   : > { %593 = shalt.err (!%p590_p4)
}
  0x79   : > { %s658_s19 = smov 64   ;;  %s659_s30 = smov 4  }
  0x7a   : > { %440 = dma.vmem_to_hbm [thread:$0]  (%p920_p0), %s855_s20, 192, %s853_s28, %s286_s25, %s658_s19, %s658_s19, %s659_s30  }
  0x7b PF: > { %s314_s21 = sand.u32 1, %s632_s9   ;;  %p921_p10 = scmp.ne.s32.totalorder %s913_s24, 0 }
  0x7c   : > { %p922_p12 = scmp.ge.s32.totalorder %s652_s14, 2  ;;  %s315_s26 = scalar_lea.sflag [#allocation4], %s314_s21 }
  0x7e   : > { %p450_p1 = pnand %p922_p12, %p921_p10 }
  0x80   : > { %627 = dma.done.wait (!%p450_p1), %s315_s26, 192  }
  0x81   : > { %629 = vsyncadd (!%p450_p1), %s315_s26, 4294967104  ;;  %s21_s14 = sadd.s32 1, %s652_s14   ;;  %s923_s9 = smov %s636_s10 }
  0x82   : > { %p18_p2 = scmp.ge.s32.totalorder %s21_s14, 4   ;;  %s924_s10 = smov %s640_s11 }
  0x83   : > { %s925_s11 = smov %s731_s23  ;;  %s926_s12 = smov %s648_s13 }
  0x84   : > { %s927_s13 = smov %s929_s17  ;;  %20 = sbr.rel (!%p18_p2) target bundleno = 8 (0x8), region = 92 }
  0x8b   :  { %320 = vsyncpa [#allocation3], 1 }
  0x8c   :  { %322 = vsyncpa [#allocation3 + $0x1], 1 }
  0x8d   :  { %323 = vsyncpa [#allocation6], 1 }
  0x8e   :  { %325 = vsyncpa [#allocation6 + $0x1], 1 }
  0x8f   :  { %326 = vsyncpa [#allocation4], 1 }
  0x90   :  { %328 = vsyncpa [#allocation4 + $0x1], 1 }

</bundles_post_ra>
